<compile_context>
chip_gen: v6e
topology: v6e:2x2x1
jax: 0.10.0
libtpu: 0.0.40
codegen_flags: <defaults>
</compile_context>

<pallas_src>
import jax
import jax.numpy as jnp
from jax.experimental import pallas as pl
from jax.experimental.pallas import tpu as pltpu


def _round_up(x, m):
    return (x + m - 1) // m * m


def _vmem_budget_bytes():
    """~80% of this generation's per-core VMEM (conservative 64 MiB fallback)."""
    try:
        cap = int(pltpu.get_tpu_info().vmem_capacity_bytes)
    except Exception:
        cap = 64 * 1024 * 1024  # v7x-sized fallback; safe on v5e/v6e too
    return int(cap * 0.8)


def gin_kernel(adj_ref, emb_ref, w1_ref, b1_ref, w2_ref, b2_ref, out_ref):
    # adjacency arrives in its storage dtype (int8/bf16/f32); cast on the VPU
    # so the MXU runs at bf16 rate.  0/1 adjacency is exact in bf16.
    adj = adj_ref[...].astype(jnp.bfloat16)

    # Neighbor aggregation:  (tm, N) @ (N, Ep) -> (tm, Ep)              [MXU]
    agg = jnp.dot(adj, emb_ref[...], preferred_element_type=jnp.float32)

    # MLP layer 1 + ReLU:    (tm, Ep) @ (Ep, Hp) + (1, Hp)              [MXU+VPU]
    h = jnp.dot(agg.astype(jnp.bfloat16), w1_ref[...],
                preferred_element_type=jnp.float32)
    h = jnp.maximum(h + b1_ref[...], 0.0)

    # MLP layer 2:           (tm, Hp) @ (Hp, Ep) + (1, Ep)              [MXU+VPU]
    out = jnp.dot(h.astype(jnp.bfloat16), w2_ref[...],
                  preferred_element_type=jnp.float32)
    out_ref[...] = (out + b2_ref[...]).astype(out_ref.dtype)


def prepare_gin_params(w1, b1, w2, b2):
    """One-time parameter prep: pad feature dims to 128 lanes, cast to bf16.

    w1: (E, hidden), b1: (hidden,), w2: (hidden, E), b2: (E,).  Weights are
    stored pre-transposed (in, out) so the kernel computes x @ W directly.
    Call this once at model-setup time, NOT per forward call.
    """
    E, hidden = w1.shape
    assert w2.shape == (hidden, E)
    Ep = _round_up(E, 128)
    Hp = _round_up(hidden, 128)
    return dict(
        w1=jnp.pad(w1.astype(jnp.bfloat16), ((0, Ep - E), (0, Hp - hidden))),
        b1=jnp.pad(b1.astype(jnp.float32), (0, Hp - hidden)).reshape(1, Hp),
        w2=jnp.pad(w2.astype(jnp.bfloat16), ((0, Hp - hidden), (0, Ep - E))),
        b2=jnp.pad(b2.astype(jnp.float32), (0, Ep - E)).reshape(1, Ep),
        E=E, hidden=hidden, Ep=Ep, Hp=Hp,
    )


def _choose_row_tile(N, Ep, adj_itemsize, resident_bytes, budget):
    """Largest adj row tile that fits the per-generation VMEM budget, with
    >= 2 'parallel' grid steps once N >= ~256 so dual-TC chips (v7x) can
    split the grid."""
    avail = max(budget - resident_bytes, 0)

    def fits(tm, adj_bufs):
        # adj pipeline buffers + double-buffered f32 output tile.
        return adj_bufs * tm * N * adj_itemsize + 2 * tm * Ep * 4 <= avail

    if N <= 128:
        return N, 2  # whole problem in one grid step (full-extent row block)
    for tm in (512, 256, 128):
        if pl.cdiv(N, tm) >= 2 and fits(tm, 2):
            # A 3rd adj buffer (when it fits) hides tile-boundary DMA latency,
            # which matters on v5e where the kernel sits near the HBM ridge.
            return tm, (3 if fits(tm, 3) else 2)
    return 128, 2


def gin_operator(adj, embeddings, params, *, interpret=False):
    """Fused GIN forward: mlp(adj @ embeddings) -> (N, E) float32.

    adj:        (N, N), any dtype.  Streamed in its original buffer (no N^2
                pad/convert pass); cast to bf16 in-kernel (exact for 0/1).
    embeddings: (N, E) -- cast to bf16 and lane-padded (cheap, O(N*E)).
    params:     output of prepare_gin_params (padded/cast once at setup).
    """
    N, E = embeddings.shape
    assert adj.shape == (N, N)
    assert params["E"] == E
    Ep, Hp = params["Ep"], params["Hp"]

    # bool VMEM layout is the least-tested path -> normalize to int8 (in real
    # use, do this once at graph-construction time and cache it).
    if adj.dtype == jnp.bool_:
        adj = adj.astype(jnp.int8)

    # Per-call embedding prep (small: N*E, vs the N^2 adjacency).
    emb_p = jnp.pad(embeddings.astype(jnp.bfloat16), ((0, 0), (0, Ep - E)))

    budget = _vmem_budget_bytes()
    # Single-buffered resident operands: embeddings + both weights + biases.
    resident = N * Ep * 2 + Ep * Hp * 2 + Hp * Ep * 2 + (Hp + Ep) * 4
    tm, adj_bufs = _choose_row_tile(N, Ep, adj.dtype.itemsize, resident, budget)
    grid = (pl.cdiv(N, tm),)
    # Note: if tm does not divide N, the last row tile's padded adj rows hold
    # unspecified values, but each output row depends only on its own adj row,
    # and the padded output rows are clipped by the out_spec store -> safe.

    hidden = params["hidden"]
    flops = 2 * N * (N * E + E * hidden + hidden * E)
    bytes_accessed = int(
        adj.size * adj.dtype.itemsize          # streamed adjacency (dominant)
        + emb_p.size * 2                       # resident bf16 embeddings
        + (params["w1"].size + params["w2"].size) * 2
        + (Hp + Ep) * 4                        # biases
        + N * Ep * 4                           # f32 output
    )

    def build(use_pipeline_mode):
        inv = dict(pipeline_mode=pl.Buffered(1)) if use_pipeline_mode else {}
        adj_pm = dict(pipeline_mode=pl.Buffered(adj_bufs)) if use_pipeline_mode else {}
        return pl.pallas_call(
            gin_kernel,
            out_shape=jax.ShapeDtypeStruct((N, Ep), jnp.float32),
            grid=grid,
            in_specs=[
                pl.BlockSpec((tm, N), lambda i: (i, 0), **adj_pm),  # adj rows (streamed)
                pl.BlockSpec((N, Ep), lambda i: (0, 0), **inv),     # embeddings (resident)
                pl.BlockSpec((Ep, Hp), lambda i: (0, 0), **inv),    # W1
                pl.BlockSpec((1, Hp), lambda i: (0, 0), **inv),     # b1
                pl.BlockSpec((Hp, Ep), lambda i: (0, 0), **inv),    # W2
                pl.BlockSpec((1, Ep), lambda i: (0, 0), **inv),     # b2
            ],
            out_specs=pl.BlockSpec((tm, Ep), lambda i: (i, 0)),
            compiler_params=pltpu.CompilerParams(
                dimension_semantics=("parallel",),
                vmem_limit_bytes=budget,
            ),
            cost_estimate=pl.CostEstimate(
                flops=flops, transcendentals=0, bytes_accessed=bytes_accessed),
            interpret=interpret,
        )

    args = (adj, emb_p, params["w1"], params["b1"], params["w2"], params["b2"])
    try:
        out_p = build(use_pipeline_mode=True)(*args)
    except Exception:
        # Fallback for jax versions without BlockSpec.pipeline_mode: default
        # double-buffering (correct, slightly more VMEM).
        out_p = build(use_pipeline_mode=False)(*args)

    # Rows are exact (no node-dim padding); slice off only the lane padding.
    return out_p[:, :E]


def gin_reference(adj, embeddings, w1, b1, w2, b2):
    y = adj.astype(jnp.float32) @ embeddings.astype(jnp.float32)
    h = jnp.maximum(y @ w1 + b1, 0.0)
    return h @ w2 + b2


if __name__ == "__main__":
    # Small shapes consistent with the module: E=32, H=4 -> hidden = E*H//2 = 64
    N, E, H = 16, 32, 4
    hidden = E * H // 2

    key = jax.random.PRNGKey(0)
    k_emb, k_adj, k_w1, k_b1, k_w2, k_b2 = jax.random.split(key, 6)

    embeddings = jax.random.normal(k_emb, (N, E), dtype=jnp.float32)
    # 0/1 adjacency kept in a narrow dtype; the bf16 cast happens in-kernel.
    adj = jax.random.bernoulli(k_adj, 0.3, (N, N)).astype(jnp.int8)

    # nn.Linear-like init, stored pre-transposed as (in, out).
    w1 = jax.random.uniform(k_w1, (E, hidden), dtype=jnp.float32,
                            minval=-1.0, maxval=1.0) / jnp.sqrt(E)
    b1 = jax.random.uniform(k_b1, (hidden,), dtype=jnp.float32,
                            minval=-1.0, maxval=1.0) / jnp.sqrt(E)
    w2 = jax.random.uniform(k_w2, (hidden, E), dtype=jnp.float32,
                            minval=-1.0, maxval=1.0) / jnp.sqrt(hidden)
    b2 = jax.random.uniform(k_b2, (E,), dtype=jnp.float32,
                            minval=-1.0, maxval=1.0) / jnp.sqrt(hidden)

    # One-time parameter prep (padding + bf16 cast hoisted out of the call path).
    params = prepare_gin_params(w1, b1, w2, b2)

    out = gin_operator(adj, embeddings, params)
    out = jax.block_until_ready(out)

    ref = gin_reference(adj, embeddings, w1, b1, w2, b2)
    assert out.shape == (N, E)
    # bf16 MXU inputs with f32 accumulation -> relaxed tolerance vs f32 reference.
    assert jnp.allclose(out, ref, atol=5e-2, rtol=5e-2), "mismatch vs reference"

    print("KERNEL_OK")
</pallas_src>

<mosaic_0001>
module attributes {stable_mosaic.version = 11 : i64} {
  func.func @gin_kernel(%arg0: i32, %arg1: memref<16x16xi8, #tpu.memory_space<vmem>>, %arg2: memref<16x128xbf16, #tpu.memory_space<vmem>>, %arg3: memref<128x128xbf16, #tpu.memory_space<vmem>>, %arg4: memref<1x128xf32, #tpu.memory_space<vmem>>, %arg5: memref<128x128xbf16, #tpu.memory_space<vmem>>, %arg6: memref<1x128xf32, #tpu.memory_space<vmem>>, %arg7: memref<16x128xf32, #tpu.memory_space<vmem>>) attributes {dimension_semantics = [#tpu.dimension_semantics<parallel>], iteration_bounds = array<i64: 1>, scalar_prefetch = 0 : i64, scratch_operands = 0 : i64, tpu.core_type = #tpu.core_type<tc>, window_params = [{pipeline_mode = #tpu.pipeline_mode<double_buffered>, transform_indices = @transform_0, window_bounds = array<i64: 16, 16>}, {pipeline_mode = #tpu.pipeline_mode<synchronous>, transform_indices = @transform_1, window_bounds = array<i64: 16, 128>}, {pipeline_mode = #tpu.pipeline_mode<synchronous>, transform_indices = @transform_2, window_bounds = array<i64: 128, 128>}, {pipeline_mode = #tpu.pipeline_mode<synchronous>, transform_indices = @transform_3, window_bounds = array<i64: 1, 128>}, {pipeline_mode = #tpu.pipeline_mode<synchronous>, transform_indices = @transform_4, window_bounds = array<i64: 128, 128>}, {pipeline_mode = #tpu.pipeline_mode<synchronous>, transform_indices = @transform_5, window_bounds = array<i64: 1, 128>}, {transform_indices = @transform_6, window_bounds = array<i64: 16, 128>}]} {
    %c0 = arith.constant 0 : index
    %c0_0 = arith.constant 0 : index
    %0 = vector.load %arg1[%c0, %c0_0] : memref<16x16xi8, #tpu.memory_space<vmem>>, vector<16x16xi8>
    %1 = arith.sitofp %0 : vector<16x16xi8> to vector<16x16xbf16>
    %c0_1 = arith.constant 0 : index
    %c0_2 = arith.constant 0 : index
    %2 = vector.load %arg2[%c0_1, %c0_2] : memref<16x128xbf16, #tpu.memory_space<vmem>>, vector<16x128xbf16>
    %cst = arith.constant dense<0.000000e+00> : vector<16x128xf32>
    %3 = tpu.matmul %1, %2, %cst {dimension_numbers = #tpu.dot_dimension_numbers<[1], [0], [0], [1], [0, 0, 1, 1], [], []>} : vector<16x16xbf16>, vector<16x128xbf16>, vector<16x128xf32> -> vector<16x128xf32>
    %4 = arith.truncf %3 : vector<16x128xf32> to vector<16x128xbf16>
    %c0_3 = arith.constant 0 : index
    %c0_4 = arith.constant 0 : index
    %5 = vector.load %arg3[%c0_3, %c0_4] : memref<128x128xbf16, #tpu.memory_space<vmem>>, vector<128x128xbf16>
    %cst_5 = arith.constant dense<0.000000e+00> : vector<16x128xf32>
    %6 = tpu.matmul %4, %5, %cst_5 {dimension_numbers = #tpu.dot_dimension_numbers<[1], [0], [0], [1], [0, 0, 1, 1], [], []>} : vector<16x128xbf16>, vector<128x128xbf16>, vector<16x128xf32> -> vector<16x128xf32>
    %c0_6 = arith.constant 0 : index
    %c0_7 = arith.constant 0 : index
    %7 = vector.load %arg4[%c0_6, %c0_7] : memref<1x128xf32, #tpu.memory_space<vmem>>, vector<1x128xf32>
    %8 = vector.broadcast %7 : vector<1x128xf32> to vector<16x128xf32>
    %9 = arith.addf %6, %8 : vector<16x128xf32>
    %cst_8 = arith.constant 0.000000e+00 : f32
    %10 = vector.broadcast %cst_8 : f32 to vector<16x128xf32>
    %11 = arith.maximumf %9, %10 : vector<16x128xf32>
    %12 = arith.truncf %11 : vector<16x128xf32> to vector<16x128xbf16>
    %c0_9 = arith.constant 0 : index
    %c0_10 = arith.constant 0 : index
    %13 = vector.load %arg5[%c0_9, %c0_10] : memref<128x128xbf16, #tpu.memory_space<vmem>>, vector<128x128xbf16>
    %cst_11 = arith.constant dense<0.000000e+00> : vector<16x128xf32>
    %14 = tpu.matmul %12, %13, %cst_11 {dimension_numbers = #tpu.dot_dimension_numbers<[1], [0], [0], [1], [0, 0, 1, 1], [], []>} : vector<16x128xbf16>, vector<128x128xbf16>, vector<16x128xf32> -> vector<16x128xf32>
    %c0_12 = arith.constant 0 : index
    %c0_13 = arith.constant 0 : index
    %15 = vector.load %arg6[%c0_12, %c0_13] : memref<1x128xf32, #tpu.memory_space<vmem>>, vector<1x128xf32>
    %16 = vector.broadcast %15 : vector<1x128xf32> to vector<16x128xf32>
    %17 = arith.addf %14, %16 : vector<16x128xf32>
    %c0_14 = arith.constant 0 : index
    %c0_15 = arith.constant 0 : index
    %18 = vector.load %arg7[%c0_14, %c0_15] : memref<16x128xf32, #tpu.memory_space<vmem>>, vector<16x128xf32>
    tpu.vector_store %arg7[%c0_14, %c0_15], %17 {strides = array<i32>} : memref<16x128xf32, #tpu.memory_space<vmem>>, vector<16x128xf32>,
    return
  }
  func.func @transform_0(%arg0: i32) -> (i32, i32) {
    %c0_i32 = arith.constant 0 : i32
    %c0_i32_0 = arith.constant 0 : i32
    return %arg0, %c0_i32 : i32, i32
  }
  func.func @transform_1(%arg0: i32) -> (i32, i32) {
    %c0_i32 = arith.constant 0 : i32
    %c0_i32_0 = arith.constant 0 : i32
    %c0_i32_1 = arith.constant 0 : i32
    return %c0_i32, %c0_i32_0 : i32, i32
  }
  func.func @transform_2(%arg0: i32) -> (i32, i32) {
    %c0_i32 = arith.constant 0 : i32
    %c0_i32_0 = arith.constant 0 : i32
    %c0_i32_1 = arith.constant 0 : i32
    return %c0_i32, %c0_i32_0 : i32, i32
  }
  func.func @transform_3(%arg0: i32) -> (i32, i32) {
    %c0_i32 = arith.constant 0 : i32
    %c0_i32_0 = arith.constant 0 : i32
    %c0_i32_1 = arith.constant 0 : i32
    return %c0_i32, %c0_i32_0 : i32, i32
  }
  func.func @transform_4(%arg0: i32) -> (i32, i32) {
    %c0_i32 = arith.constant 0 : i32
    %c0_i32_0 = arith.constant 0 : i32
    %c0_i32_1 = arith.constant 0 : i32
    return %c0_i32, %c0_i32_0 : i32, i32
  }
  func.func @transform_5(%arg0: i32) -> (i32, i32) {
    %c0_i32 = arith.constant 0 : i32
    %c0_i32_0 = arith.constant 0 : i32
    %c0_i32_1 = arith.constant 0 : i32
    return %c0_i32, %c0_i32_0 : i32, i32
  }
  func.func @transform_6(%arg0: i32) -> (i32, i32) {
    %c0_i32 = arith.constant 0 : i32
    %c0_i32_0 = arith.constant 0 : i32
    return %arg0, %c0_i32 : i32, i32
  }
}

module attributes {stable_mosaic.version = 11 : i64} {
  func.func @gin_kernel(%arg0: i32, %arg1: memref<16x16xi8, #tpu.memory_space<vmem>>, %arg2: memref<16x128xbf16, #tpu.memory_space<vmem>>, %arg3: memref<128x128xbf16, #tpu.memory_space<vmem>>, %arg4: memref<1x128xf32, #tpu.memory_space<vmem>>, %arg5: memref<128x128xbf16, #tpu.memory_space<vmem>>, %arg6: memref<1x128xf32, #tpu.memory_space<vmem>>, %arg7: memref<16x128xf32, #tpu.memory_space<vmem>>) attributes {dimension_semantics = [#tpu.dimension_semantics<parallel>], iteration_bounds = array<i64: 1>, scalar_prefetch = 0 : i64, scratch_operands = 0 : i64, tpu.core_type = #tpu.core_type<tc>, window_params = [{transform_indices = @transform_0, window_bounds = array<i64: 16, 16>}, {pipeline_mode = #tpu.pipeline_mode<synchronous>, transform_indices = @transform_1, window_bounds = array<i64: 16, 128>}, {pipeline_mode = #tpu.pipeline_mode<synchronous>, transform_indices = @transform_2, window_bounds = array<i64: 128, 128>}, {pipeline_mode = #tpu.pipeline_mode<synchronous>, transform_indices = @transform_3, window_bounds = array<i64: 1, 128>}, {pipeline_mode = #tpu.pipeline_mode<synchronous>, transform_indices = @transform_4, window_bounds = array<i64: 128, 128>}, {pipeline_mode = #tpu.pipeline_mode<synchronous>, transform_indices = @transform_5, window_bounds = array<i64: 1, 128>}, {transform_indices = @transform_6, window_bounds = array<i64: 16, 128>}]} {
    %c0 = arith.constant 0 : index
    %c0_0 = arith.constant 0 : index
    %0 = vector.load %arg1[%c0, %c0_0] : memref<16x16xi8, #tpu.memory_space<vmem>>, vector<16x16xi8>
    %1 = arith.sitofp %0 : vector<16x16xi8> to vector<16x16xbf16>
    %c0_1 = arith.constant 0 : index
    %c0_2 = arith.constant 0 : index
    %2 = vector.load %arg2[%c0_1, %c0_2] : memref<16x128xbf16, #tpu.memory_space<vmem>>, vector<16x128xbf16>
    %cst = arith.constant dense<0.000000e+00> : vector<16x128xf32>
    %3 = tpu.matmul %1, %2, %cst {dimension_numbers = #tpu.dot_dimension_numbers<[1], [0], [0], [1], [0, 0, 1, 1], [], []>} : vector<16x16xbf16>, vector<16x128xbf16>, vector<16x128xf32> -> vector<16x128xf32>
    %4 = arith.truncf %3 : vector<16x128xf32> to vector<16x128xbf16>
    %c0_3 = arith.constant 0 : index
    %c0_4 = arith.constant 0 : index
    %5 = vector.load %arg3[%c0_3, %c0_4] : memref<128x128xbf16, #tpu.memory_space<vmem>>, vector<128x128xbf16>
    %cst_5 = arith.constant dense<0.000000e+00> : vector<16x128xf32>
    %6 = tpu.matmul %4, %5, %cst_5 {dimension_numbers = #tpu.dot_dimension_numbers<[1], [0], [0], [1], [0, 0, 1, 1], [], []>} : vector<16x128xbf16>, vector<128x128xbf16>, vector<16x128xf32> -> vector<16x128xf32>
    %c0_6 = arith.constant 0 : index
    %c0_7 = arith.constant 0 : index
    %7 = vector.load %arg4[%c0_6, %c0_7] : memref<1x128xf32, #tpu.memory_space<vmem>>, vector<1x128xf32>
    %8 = vector.broadcast %7 : vector<1x128xf32> to vector<16x128xf32>
    %9 = arith.addf %6, %8 : vector<16x128xf32>
    %cst_8 = arith.constant 0.000000e+00 : f32
    %10 = vector.broadcast %cst_8 : f32 to vector<16x128xf32>
    %11 = arith.maximumf %9, %10 : vector<16x128xf32>
    %12 = arith.truncf %11 : vector<16x128xf32> to vector<16x128xbf16>
    %c0_9 = arith.constant 0 : index
    %c0_10 = arith.constant 0 : index
    %13 = vector.load %arg5[%c0_9, %c0_10] : memref<128x128xbf16, #tpu.memory_space<vmem>>, vector<128x128xbf16>
    %cst_11 = arith.constant dense<0.000000e+00> : vector<16x128xf32>
    %14 = tpu.matmul %12, %13, %cst_11 {dimension_numbers = #tpu.dot_dimension_numbers<[1], [0], [0], [1], [0, 0, 1, 1], [], []>} : vector<16x128xbf16>, vector<128x128xbf16>, vector<16x128xf32> -> vector<16x128xf32>
    %c0_12 = arith.constant 0 : index
    %c0_13 = arith.constant 0 : index
    %15 = vector.load %arg6[%c0_12, %c0_13] : memref<1x128xf32, #tpu.memory_space<vmem>>, vector<1x128xf32>
    %16 = vector.broadcast %15 : vector<1x128xf32> to vector<16x128xf32>
    %17 = arith.addf %14, %16 : vector<16x128xf32>
    %c0_14 = arith.constant 0 : index
    %c0_15 = arith.constant 0 : index
    %18 = vector.load %arg7[%c0_14, %c0_15] : memref<16x128xf32, #tpu.memory_space<vmem>>, vector<16x128xf32>
    tpu.vector_store %arg7[%c0_14, %c0_15], %17 {strides = array<i32>} : memref<16x128xf32, #tpu.memory_space<vmem>>, vector<16x128xf32>,
    return
  }
  func.func @transform_0(%arg0: i32) -> (i32, i32) {
    %c0_i32 = arith.constant 0 : i32
    %c0_i32_0 = arith.constant 0 : i32
    return %arg0, %c0_i32 : i32, i32
  }
  func.func @transform_1(%arg0: i32) -> (i32, i32) {
    %c0_i32 = arith.constant 0 : i32
    %c0_i32_0 = arith.constant 0 : i32
    %c0_i32_1 = arith.constant 0 : i32
    return %c0_i32, %c0_i32_0 : i32, i32
  }
  func.func @transform_2(%arg0: i32) -> (i32, i32) {
    %c0_i32 = arith.constant 0 : i32
    %c0_i32_0 = arith.constant 0 : i32
    %c0_i32_1 = arith.constant 0 : i32
    return %c0_i32, %c0_i32_0 : i32, i32
  }
  func.func @transform_3(%arg0: i32) -> (i32, i32) {
    %c0_i32 = arith.constant 0 : i32
    %c0_i32_0 = arith.constant 0 : i32
    %c0_i32_1 = arith.constant 0 : i32
    return %c0_i32, %c0_i32_0 : i32, i32
  }
  func.func @transform_4(%arg0: i32) -> (i32, i32) {
    %c0_i32 = arith.constant 0 : i32
    %c0_i32_0 = arith.constant 0 : i32
    %c0_i32_1 = arith.constant 0 : i32
    return %c0_i32, %c0_i32_0 : i32, i32
  }
  func.func @transform_5(%arg0: i32) -> (i32, i32) {
    %c0_i32 = arith.constant 0 : i32
    %c0_i32_0 = arith.constant 0 : i32
    %c0_i32_1 = arith.constant 0 : i32
    return %c0_i32, %c0_i32_0 : i32, i32
  }
  func.func @transform_6(%arg0: i32) -> (i32, i32) {
    %c0_i32 = arith.constant 0 : i32
    %c0_i32_0 = arith.constant 0 : i32
    return %arg0, %c0_i32 : i32, i32
  }
}

</mosaic_0001>

<bundles_post_ra>
// kernel: tpu_custom_call.1
= control target key start
LH: loop header
LB: loop body
LE: loop exit
PB: predicated region body
PF: predicated region fallthrough
CT: control target
= control target key end

     0   :  { %11 = vsyncpa [#allocation3], 0  ;;  %s717_s0 = inlined_call_operand.hbm [shape: s8[16,16], index: 0, kind: input, shape index: {}]   ;;  %s718_s1 = inlined_call_operand.hbm [shape: bf16[16,128], index: 1, kind: input, shape index: {}]   ;;  %s719_s2 = inlined_call_operand.hbm [shape: bf16[128,128], index: 2, kind: input, shape index: {}]   ;;  %s720_s3 = inlined_call_operand.vmem [shape: f32[1,128], index: 3, kind: input, shape index: {}]   ;;  %s721_s4 = inlined_call_operand.hbm [shape: bf16[128,128], index: 4, kind: input, shape index: {}]   ;;  %s722_s5 = inlined_call_operand.vmem [shape: f32[1,128], index: 5, kind: input, shape index: {}]   ;;  %s723_s6 = inlined_call_operand.hbm [shape: f32[16,128], index: 6, kind: output, shape index: {}]  }
   0x1   :  { %12 = vsyncpa [#allocation6], 0 }
   0x2   :  { %13 = vsyncpa [#allocation9], 0 }
   0x3   :  { %14 = vsyncpa [#allocation4], 0  ;;  %s616_s21 = smov [#allocation5]  }
   0x4   :  { %s32_s22 = sshll.u32 %s616_s21, 4  ;;  %s33_s22 = int_to_ptr.vmem [resolvable:$true] %s32_s22 }
   0x5   :  { %s516_s23 = scalar_lea.vmem %s33_s22, 128  ;;  %p521_p1 = scmp.lt.s32.totalorder %s33_s22, %s33_s22 }
   0x6   :  { %p517_p0 = scmp.ne.s32.totalorder %s33_s22, %s516_s23  ;;  %p522_p2 = scmp.lt.s32.totalorder %s516_s23, %s516_s23 }
   0x8   :  { %p523_p3 = por %p522_p2, %p521_p1 }
   0xa   :  { %p524_p4 = pnand %p523_p3, %p517_p0 }
   0xc   :  { %527 = shalt.err (!%p524_p4)
}
   0xd   :  { %s617_s24 = smov 64   ;;  %s618_s25 = smov 4  }
   0xe   :  { %38 = dma.hbm_to_vmem [thread:$0]  %s718_s1, 128, %s33_s22, [#allocation6], %s617_s24, %s617_s24, %s618_s25  }
   0xf   :  { %s619_s28 = smov [#allocation2]  }
  0x10   :  { %s20_s29 = sshll.u32 %s619_s28, 4  ;;  %s21_s29 = int_to_ptr.vmem [resolvable:$true] %s20_s29 }
  0x11   :  { %s536_s30 = scalar_lea.vmem %s21_s29, 64  ;;  %p541_p6 = scmp.lt.s32.totalorder %s21_s29, %s21_s29 }
  0x12   :  { %p537_p5 = scmp.ne.s32.totalorder %s21_s29, %s536_s30  ;;  %p542_p7 = scmp.lt.s32.totalorder %s536_s30, %s536_s30 }
  0x14   :  { %p543_p8 = por %p542_p7, %p541_p6 }
  0x16   :  { %p544_p9 = pnand %p543_p8, %p537_p5 }
  0x18   :  { %547 = shalt.err (!%p544_p9)
}
  0x19   :  { %s620_s7 = smov 32   ;;  %s621_s8 = smov 2  }
  0x1a   :  { %26 = dma.hbm_to_vmem [thread:$0]  %s717_s0, 64, %s21_s29, [#allocation3], %s620_s7, %s620_s7, %s621_s8  }
  0x1b   :  { %s622_s11 = smov [#allocation7]   ;;  %s623_s13 = smov [#allocation8]  }
  0x1c   :  { %s44_s12 = sshll.u32 %s622_s11, 4  ;;  %s58_s1 = sshll.u32 %s623_s13, 4  ;;  %s45_s12 = int_to_ptr.vmem [resolvable:$true] %s44_s12  ;;  %s59_s1 = int_to_ptr.vmem [resolvable:$true] %s58_s1 }
  0x1d   :  { %s556_s14 = scalar_lea.vmem %s45_s12, 1024  ;;  %p561_p11 = scmp.lt.s32.totalorder %s45_s12, %s45_s12 }
  0x1e   :  { %p557_p10 = scmp.ne.s32.totalorder %s45_s12, %s556_s14  ;;  %p562_p12 = scmp.lt.s32.totalorder %s556_s14, %s556_s14 }
  0x20   :  { %p563_p13 = por %p562_p12, %p561_p11 }
  0x22   :  { %p564_p0 = pnand %p563_p13, %p557_p10 }
  0x24   :  { %567 = shalt.err (!%p564_p0)
}
  0x25   :  { %50 = dma.hbm_to_vmem [thread:$0]  %s719_s2, 1024, %s45_s12, [#allocation6], %s617_s24, %s617_s24, %s618_s25  }
  0x26   :  { %s576_s0 = scalar_lea.vmem %s59_s1, 1024  ;;  %p581_p2 = scmp.lt.s32.totalorder %s59_s1, %s59_s1 }
  0x27   :  { %p577_p1 = scmp.ne.s32.totalorder %s59_s1, %s576_s0  ;;  %p582_p3 = scmp.lt.s32.totalorder %s576_s0, %s576_s0 }
  0x29   :  { %p583_p4 = por %p582_p3, %p581_p2 }
  0x2b   :  { %p584_p5 = pnand %p583_p4, %p577_p1 }
  0x2d   :  { %587 = shalt.err (!%p584_p5)
}
  0x2e   :  { %64 = dma.hbm_to_vmem [thread:$0]  %s721_s4, 1024, %s59_s1, [#allocation9], %s617_s24, %s617_s24, %s618_s25  }
  0x2f   :  { %608 = dma.done.wait [#allocation3], 64  }
  0x30   :  { %609 = vsyncadd [#allocation3], 4294967232 }
  0x31   :  { %610 = dma.done.wait [#allocation6], 1152  }
  0x32   :  { %611 = vsyncadd [#allocation6], 4294966144 }
  0x33   :  { %612 = dma.done.wait [#allocation9], 1024  }
  0x34   :  { %613 = vsyncadd [#allocation9], 4294966272  ;;  %v624_v0 = vmov 0.0   ;;  %vm625_vm0 = vmmov 0   ;;  %v491_v1 = vld [vmem:[#allocation5] sm:$0xff]   ;;  %vm97_vm1 = vcmask 130048  }
  0x35   :  { %432 = vmatprep.subr.bf16.mxu0 %v624_v0  ;;  %434 = vmatprep.mubr.msk.bf16.mxu0 %vm625_vm0, %v624_v0  ;;  %v80_v2 = vld [vmem:[#allocation2] sm:$0x3]  ;;  %v81_v3 = vld [vmem:[#allocation2 + $0x2] sm:$0x3]  ;;  %v492_v6 = vld [vmem:[#allocation7 + $0x38] sm:$0xff]   ;;  %s626_s21 = smov [#allocation10]  }
  0x36   :  { %438 = vmatprep.subr.bf16.mxu1 %v624_v0  ;;  %454 = vmatprep.mubr.msk.bf16.mxu1 %vm625_vm0, %v624_v0  ;;  %v82_v4 = vunpack.c.l.s8.bf16 %v80_v2  ;;  %v83_v5 = vunpack.c.l.s8.bf16 %v81_v3  ;;  %v493_v8 = vld [vmem:[#allocation7 + $0x30] sm:$0xff]   ;;  %v494_v9 = vld [vmem:[#allocation7 + $0x28] sm:$0xff]   ;;  %v495_v10 = vld [vmem:[#allocation7 + $0x20] sm:$0xff]   ;;  %s377_s22 = sshll.u32 %s626_s21, 4  ;;  %s378_s22 = int_to_ptr.vmem [resolvable:$true] %s377_s22 }
  0x37   :  { %433 = vmatpush3.bf16.msra.mxu0 %v491_v1  ;;  %439 = vmatpush3.bf16.msra.mxu1 %v492_v6  ;;  %v496_v11 = vld [vmem:[#allocation7 + $0x18] sm:$0xff]   ;;  %v497_v12 = vld [vmem:[#allocation7 + $0x10] sm:$0xff]   ;;  %v498_v13 = vld [vmem:[#allocation7 + $0x8] sm:$0xff]   ;;  %p593_p7 = scmp.lt.s32.totalorder %s378_s22, %s378_s22 }
  0x38   :  { %458 = vmatprep.subr.bf16.mxu0 %v624_v0  ;;  %v391_v7 = vcombine.low %v82_v4, %v83_v5  ;;  %440 = vmatprep.subr.bf16.mxu1 %v624_v0  ;;  %v499_v14 = vld [vmem:[#allocation7] sm:$0xff]   ;;  %v500_v15 = vld [vmem:[#allocation8 + $0x38] sm:$0xff]   ;;  %v501_v16 = vld [vmem:[#allocation8 + $0x30] sm:$0xff]  }
  0x39   :  { %v502_v17 = vld [vmem:[#allocation8 + $0x28] sm:$0xff]   ;;  %v503_v18 = vld [vmem:[#allocation8 + $0x20] sm:$0xff]   ;;  %v504_v19 = vld [vmem:[#allocation8 + $0x18] sm:$0xff]  }
  0x3a   :  { %435 = vmatmul.mubr.msk.bf16.vlgmr.msra.gmra.mxu0 %vm97_vm1, %v391_v7  ;;  %v505_v25 = vld [vmem:[#allocation8 + $0x10] sm:$0xff]   ;;  %v506_v26 = vld [vmem:[#allocation8 + $0x8] sm:$0xff]   ;;  %v507_v27 = vld [vmem:[#allocation8] sm:$0xff]  }
  0x3b   :  { %474 = vmatprep.mubr.msk.bf16.mxu0 %vm625_vm0, %v624_v0  ;;  %441 = vmatpush3.bf16.msra.mxu1 %v493_v8  ;;  %v394_v28 = vld [vmem:[%s720_s3] ss:$0 sm:$0xff]  ;;  %s588_s3 = scalar_lea.vmem %s378_s22, 256 }
  0x3c   :  { %442 = vmatprep.subr.bf16.mxu1 %v624_v0  ;;  %459 = vmatpush3.bf16.msra.mxu0 %v500_v15  ;;  %v403_v38 = vld [vmem:[%s722_s5] ss:$0 sm:$0xff]  ;;  %p589_p6 = scmp.ne.s32.totalorder %s378_s22, %s588_s3  ;;  %p594_p8 = scmp.lt.s32.totalorder %s588_s3, %s588_s3 }
  0x3d   :  { %460 = vmatprep.subr.bf16.mxu0 %v624_v0 }
  0x3e   :  { %p595_p9 = por %p594_p8, %p593_p7 }
  0x3f   :  { %443 = vmatpush3.bf16.msra.mxu1 %v494_v9 }
  0x40   :  { %444 = vmatprep.subr.bf16.mxu1 %v624_v0  ;;  %461 = vmatpush3.bf16.msra.mxu0 %v501_v16  ;;  %p596_p10 = pnand %p595_p9, %p589_p6 }
  0x41   :  { %462 = vmatprep.subr.bf16.mxu0 %v624_v0 }
  0x43   :  { %445 = vmatpush3.bf16.msra.mxu1 %v495_v10 }
  0x44   :  { %446 = vmatprep.subr.bf16.mxu1 %v624_v0  ;;  %463 = vmatpush3.bf16.msra.mxu0 %v502_v17 }
  0x45   :  { %464 = vmatprep.subr.bf16.mxu0 %v624_v0 }
  0x47   :  { %447 = vmatpush3.bf16.msra.mxu1 %v496_v11 }
  0x48   :  { %448 = vmatprep.subr.bf16.mxu1 %v624_v0  ;;  %465 = vmatpush3.bf16.msra.mxu0 %v503_v18 }
  0x49   :  { %466 = vmatprep.subr.bf16.mxu0 %v624_v0 }
  0x4b   :  { %449 = vmatpush3.bf16.msra.mxu1 %v497_v12 }
  0x4c   :  { %450 = vmatprep.subr.bf16.mxu1 %v624_v0  ;;  %467 = vmatpush3.bf16.msra.mxu0 %v504_v19 }
  0x4d   :  { %468 = vmatprep.subr.bf16.mxu0 %v624_v0 }
  0x4f   :  { %451 = vmatpush3.bf16.msra.mxu1 %v498_v13 }
  0x50   :  { %452 = vmatprep.subr.bf16.mxu1 %v624_v0  ;;  %469 = vmatpush3.bf16.msra.mxu0 %v505_v25 }
  0x51   :  { %470 = vmatprep.subr.bf16.mxu0 %v624_v0 }
  0x53   :  { %453 = vmatpush3.bf16.msra.mxu1 %v499_v14 }
  0x54   :  { %471 = vmatpush3.bf16.msra.mxu0 %v506_v26 }
  0x55   :  { %472 = vmatprep.subr.bf16.mxu0 %v624_v0 }
  0x58   :  { %473 = vmatpush3.bf16.msra.mxu0 %v507_v27 }
  0xfa   :  { %v135_v20 = vpop.f32.mrf.mxu0 }
  0xfc   :  { %v436_v21 = vpop.f32.mrf.mxu0 }
  0xfe   :  { %v138_v22 = vpop.f32.mrf.mxu0 }
  0xff   :  { %v142_v23 = vpack.c.bf16 %v138_v22, %v135_v20 }
 0x100   :  { %v437_v24 = vpop.f32.mrf.mxu0 }
 0x101   :  { %455 = vmatmul.mubr.bf16.vlgmr.msra.gmra.mxu1 %v142_v23 }
 0x1c1   :  { %v248_v29 = vpop.f32.mrf.mxu1 }
 0x1c2   :  { %v249_v31 = vadd.f32 %v394_v28, %v248_v29 }
 0x1c3   :  { %v456_v30 = vpop.f32.mrf.mxu1 }
 0x1c4   :  { %v255_v35 = vmax.f32 %v249_v31, 0.0 }
 0x1c5   :  { %v251_v32 = vpop.f32.mrf.mxu1 }
 0x1c6   :  { %v252_v33 = vadd.f32 %v394_v28, %v251_v32 }
 0x1c7   :  { %v457_v34 = vpop.f32.mrf.mxu1 }
 0x1c8   :  { %v256_v36 = vmax.f32 %v252_v33, 0.0 }
 0x1ca   :  { %v257_v37 = vpack.c.bf16 %v256_v36, %v255_v35 }
 0x1cc   :  { %475 = vmatmul.mubr.bf16.vlgmr.msra.gmra.mxu0 %v257_v37 }
 0x28c   :  { %v363_v39 = vpop.f32.mrf.mxu0 }
 0x28d   :  { %v364_v40 = vadd.f32 %v403_v38, %v363_v39 }
 0x28e   :  { %v476_v41 = vpop.f32.mrf.mxu0 }
 0x28f   :  { %370 = vst [vmem:[#allocation10] sm:$0xff] %v364_v40 }
 0x290   :  { %v366_v42 = vpop.f32.mrf.mxu0 }
 0x291   :  { %v367_v43 = vadd.f32 %v403_v38, %v366_v42 }
 0x292   :  { %v477_v44 = vpop.f32.mrf.mxu0 }
 0x293   :  { %371 = vst [vmem:[#allocation10 + $0x8] sm:$0xff] %v367_v43 }
 0x294   :  { %599 = shalt.err (!%p596_p10)
}
 0x295   :  { %s627_s23 = smov 128   ;;  %s628_s5 = smov 8  }
 0x296   :  { %383 = dma.vmem_to_hbm [thread:$0]  %s378_s22, 256, %s723_s6, [#allocation4], %s627_s23, %s627_s23, %s628_s5  }
 0x297   :  { %614 = dma.done.wait [#allocation4], 256  }
 0x298   :  { %615 = vsyncadd [#allocation4], 4294967040 }
 0x299   :  { %387 = vsyncpa [#allocation3], 1 }
 0x29a   :  { %388 = vsyncpa [#allocation6], 1 }
 0x29b   :  { %389 = vsyncpa [#allocation9], 1 }
 0x29c   :  { %390 = vsyncpa [#allocation4], 1 }

// kernel: tpu_custom_call.1
= control target key start
LH: loop header
LB: loop body
LE: loop exit
PB: predicated region body
PF: predicated region fallthrough
CT: control target
= control target key end

     0   :  { %11 = vsyncpa [#allocation3], 0  ;;  %s717_s0 = inlined_call_operand.hbm [shape: s8[16,16], index: 0, kind: input, shape index: {}]   ;;  %s718_s1 = inlined_call_operand.hbm [shape: bf16[16,128], index: 1, kind: input, shape index: {}]   ;;  %s719_s2 = inlined_call_operand.hbm [shape: bf16[128,128], index: 2, kind: input, shape index: {}]   ;;  %s720_s3 = inlined_call_operand.vmem [shape: f32[1,128], index: 3, kind: input, shape index: {}]   ;;  %s721_s4 = inlined_call_operand.hbm [shape: bf16[128,128], index: 4, kind: input, shape index: {}]   ;;  %s722_s5 = inlined_call_operand.vmem [shape: f32[1,128], index: 5, kind: input, shape index: {}]   ;;  %s723_s6 = inlined_call_operand.hbm [shape: f32[16,128], index: 6, kind: output, shape index: {}]  }
   0x1   :  { %12 = vsyncpa [#allocation6], 0 }
   0x2   :  { %13 = vsyncpa [#allocation9], 0 }
   0x3   :  { %14 = vsyncpa [#allocation4], 0  ;;  %s616_s21 = smov [#allocation5]  }
   0x4   :  { %s32_s22 = sshll.u32 %s616_s21, 4  ;;  %s33_s22 = int_to_ptr.vmem [resolvable:$true] %s32_s22 }
   0x5   :  { %s516_s23 = scalar_lea.vmem %s33_s22, 128  ;;  %p521_p1 = scmp.lt.s32.totalorder %s33_s22, %s33_s22 }
   0x6   :  { %p517_p0 = scmp.ne.s32.totalorder %s33_s22, %s516_s23  ;;  %p522_p2 = scmp.lt.s32.totalorder %s516_s23, %s516_s23 }
   0x8   :  { %p523_p3 = por %p522_p2, %p521_p1 }
   0xa   :  { %p524_p4 = pnand %p523_p3, %p517_p0 }
   0xc   :  { %527 = shalt.err (!%p524_p4)
}
   0xd   :  { %s617_s24 = smov 64   ;;  %s618_s25 = smov 4  }
   0xe   :  { %38 = dma.hbm_to_vmem [thread:$0]  %s718_s1, 128, %s33_s22, [#allocation6], %s617_s24, %s617_s24, %s618_s25  }
   0xf   :  { %s619_s28 = smov [#allocation2]  }
  0x10   :  { %s20_s29 = sshll.u32 %s619_s28, 4  ;;  %s21_s29 = int_to_ptr.vmem [resolvable:$true] %s20_s29 }
  0x11   :  { %s536_s30 = scalar_lea.vmem %s21_s29, 64  ;;  %p541_p6 = scmp.lt.s32.totalorder %s21_s29, %s21_s29 }
  0x12   :  { %p537_p5 = scmp.ne.s32.totalorder %s21_s29, %s536_s30  ;;  %p542_p7 = scmp.lt.s32.totalorder %s536_s30, %s536_s30 }
  0x14   :  { %p543_p8 = por %p542_p7, %p541_p6 }
  0x16   :  { %p544_p9 = pnand %p543_p8, %p537_p5 }
  0x18   :  { %547 = shalt.err (!%p544_p9)
}
  0x19   :  { %s620_s7 = smov 32   ;;  %s621_s8 = smov 2  }
  0x1a   :  { %26 = dma.hbm_to_vmem [thread:$0]  %s717_s0, 64, %s21_s29, [#allocation3], %s620_s7, %s620_s7, %s621_s8  }
  0x1b   :  { %s622_s11 = smov [#allocation7]   ;;  %s623_s13 = smov [#allocation8]  }
  0x1c   :  { %s44_s12 = sshll.u32 %s622_s11, 4  ;;  %s58_s1 = sshll.u32 %s623_s13, 4  ;;  %s45_s12 = int_to_ptr.vmem [resolvable:$true] %s44_s12  ;;  %s59_s1 = int_to_ptr.vmem [resolvable:$true] %s58_s1 }
  0x1d   :  { %s556_s14 = scalar_lea.vmem %s45_s12, 1024  ;;  %p561_p11 = scmp.lt.s32.totalorder %s45_s12, %s45_s12 }
  0x1e   :  { %p557_p10 = scmp.ne.s32.totalorder %s45_s12, %s556_s14  ;;  %p562_p12 = scmp.lt.s32.totalorder %s556_s14, %s556_s14 }
  0x20   :  { %p563_p13 = por %p562_p12, %p561_p11 }
  0x22   :  { %p564_p0 = pnand %p563_p13, %p557_p10 }
  0x24   :  { %567 = shalt.err (!%p564_p0)
}
  0x25   :  { %50 = dma.hbm_to_vmem [thread:$0]  %s719_s2, 1024, %s45_s12, [#allocation6], %s617_s24, %s617_s24, %s618_s25  }
  0x26   :  { %s576_s0 = scalar_lea.vmem %s59_s1, 1024  ;;  %p581_p2 = scmp.lt.s32.totalorder %s59_s1, %s59_s1 }
  0x27   :  { %p577_p1 = scmp.ne.s32.totalorder %s59_s1, %s576_s0  ;;  %p582_p3 = scmp.lt.s32.totalorder %s576_s0, %s576_s0 }
  0x29   :  { %p583_p4 = por %p582_p3, %p581_p2 }
  0x2b   :  { %p584_p5 = pnand %p583_p4, %p577_p1 }
  0x2d   :  { %587 = shalt.err (!%p584_p5)
}
  0x2e   :  { %64 = dma.hbm_to_vmem [thread:$0]  %s721_s4, 1024, %s59_s1, [#allocation9], %s617_s24, %s617_s24, %s618_s25  }
  0x2f   :  { %608 = dma.done.wait [#allocation3], 64  }
  0x30   :  { %609 = vsyncadd [#allocation3], 4294967232 }
  0x31   :  { %610 = dma.done.wait [#allocation6], 1152  }
  0x32   :  { %611 = vsyncadd [#allocation6], 4294966144 }
  0x33   :  { %612 = dma.done.wait [#allocation9], 1024  }
  0x34   :  { %613 = vsyncadd [#allocation9], 4294966272  ;;  %v624_v0 = vmov 0.0   ;;  %vm625_vm0 = vmmov 0   ;;  %v491_v1 = vld [vmem:[#allocation5] sm:$0xff]   ;;  %vm97_vm1 = vcmask 130048  }
  0x35   :  { %432 = vmatprep.subr.bf16.mxu0 %v624_v0  ;;  %434 = vmatprep.mubr.msk.bf16.mxu0 %vm625_vm0, %v624_v0  ;;  %v80_v2 = vld [vmem:[#allocation2] sm:$0x3]  ;;  %v81_v3 = vld [vmem:[#allocation2 + $0x2] sm:$0x3]  ;;  %v492_v6 = vld [vmem:[#allocation7 + $0x38] sm:$0xff]   ;;  %s626_s21 = smov [#allocation10]  }
  0x36   :  { %438 = vmatprep.subr.bf16.mxu1 %v624_v0  ;;  %454 = vmatprep.mubr.msk.bf16.mxu1 %vm625_vm0, %v624_v0  ;;  %v82_v4 = vunpack.c.l.s8.bf16 %v80_v2  ;;  %v83_v5 = vunpack.c.l.s8.bf16 %v81_v3  ;;  %v493_v8 = vld [vmem:[#allocation7 + $0x30] sm:$0xff]   ;;  %v494_v9 = vld [vmem:[#allocation7 + $0x28] sm:$0xff]   ;;  %v495_v10 = vld [vmem:[#allocation7 + $0x20] sm:$0xff]   ;;  %s377_s22 = sshll.u32 %s626_s21, 4  ;;  %s378_s22 = int_to_ptr.vmem [resolvable:$true] %s377_s22 }
  0x37   :  { %433 = vmatpush3.bf16.msra.mxu0 %v491_v1  ;;  %439 = vmatpush3.bf16.msra.mxu1 %v492_v6  ;;  %v496_v11 = vld [vmem:[#allocation7 + $0x18] sm:$0xff]   ;;  %v497_v12 = vld [vmem:[#allocation7 + $0x10] sm:$0xff]   ;;  %v498_v13 = vld [vmem:[#allocation7 + $0x8] sm:$0xff]   ;;  %p593_p7 = scmp.lt.s32.totalorder %s378_s22, %s378_s22 }
  0x38   :  { %458 = vmatprep.subr.bf16.mxu0 %v624_v0  ;;  %v391_v7 = vcombine.low %v82_v4, %v83_v5  ;;  %440 = vmatprep.subr.bf16.mxu1 %v624_v0  ;;  %v499_v14 = vld [vmem:[#allocation7] sm:$0xff]   ;;  %v500_v15 = vld [vmem:[#allocation8 + $0x38] sm:$0xff]   ;;  %v501_v16 = vld [vmem:[#allocation8 + $0x30] sm:$0xff]  }
  0x39   :  { %v502_v17 = vld [vmem:[#allocation8 + $0x28] sm:$0xff]   ;;  %v503_v18 = vld [vmem:[#allocation8 + $0x20] sm:$0xff]   ;;  %v504_v19 = vld [vmem:[#allocation8 + $0x18] sm:$0xff]  }
  0x3a   :  { %435 = vmatmul.mubr.msk.bf16.vlgmr.msra.gmra.mxu0 %vm97_vm1, %v391_v7  ;;  %v505_v25 = vld [vmem:[#allocation8 + $0x10] sm:$0xff]   ;;  %v506_v26 = vld [vmem:[#allocation8 + $0x8] sm:$0xff]   ;;  %v507_v27 = vld [vmem:[#allocation8] sm:$0xff]  }
  0x3b   :  { %474 = vmatprep.mubr.msk.bf16.mxu0 %vm625_vm0, %v624_v0  ;;  %441 = vmatpush3.bf16.msra.mxu1 %v493_v8  ;;  %v394_v28 = vld [vmem:[%s720_s3] ss:$0 sm:$0xff]  ;;  %s588_s3 = scalar_lea.vmem %s378_s22, 256 }
  0x3c   :  { %442 = vmatprep.subr.bf16.mxu1 %v624_v0  ;;  %459 = vmatpush3.bf16.msra.mxu0 %v500_v15  ;;  %v403_v38 = vld [vmem:[%s722_s5] ss:$0 sm:$0xff]  ;;  %p589_p6 = scmp.ne.s32.totalorder %s378_s22, %s588_s3  ;;  %p594_p8 = scmp.lt.s32.totalorder %s588_s3, %s588_s3 }
  0x3d   :  { %460 = vmatprep.subr.bf16.mxu0 %v624_v0 }
  0x3e   :  { %p595_p9 = por %p594_p8, %p593_p7 }
  0x3f   :  { %443 = vmatpush3.bf16.msra.mxu1 %v494_v9 }
  0x40   :  { %444 = vmatprep.subr.bf16.mxu1 %v624_v0  ;;  %461 = vmatpush3.bf16.msra.mxu0 %v501_v16  ;;  %p596_p10 = pnand %p595_p9, %p589_p6 }
  0x41   :  { %462 = vmatprep.subr.bf16.mxu0 %v624_v0 }
  0x43   :  { %445 = vmatpush3.bf16.msra.mxu1 %v495_v10 }
  0x44   :  { %446 = vmatprep.subr.bf16.mxu1 %v624_v0  ;;  %463 = vmatpush3.bf16.msra.mxu0 %v502_v17 }
  0x45   :  { %464 = vmatprep.subr.bf16.mxu0 %v624_v0 }
  0x47   :  { %447 = vmatpush3.bf16.msra.mxu1 %v496_v11 }
  0x48   :  { %448 = vmatprep.subr.bf16.mxu1 %v624_v0  ;;  %465 = vmatpush3.bf16.msra.mxu0 %v503_v18 }
  0x49   :  { %466 = vmatprep.subr.bf16.mxu0 %v624_v0 }
  0x4b   :  { %449 = vmatpush3.bf16.msra.mxu1 %v497_v12 }
  0x4c   :  { %450 = vmatprep.subr.bf16.mxu1 %v624_v0  ;;  %467 = vmatpush3.bf16.msra.mxu0 %v504_v19 }
  0x4d   :  { %468 = vmatprep.subr.bf16.mxu0 %v624_v0 }
  0x4f   :  { %451 = vmatpush3.bf16.msra.mxu1 %v498_v13 }
  0x50   :  { %452 = vmatprep.subr.bf16.mxu1 %v624_v0  ;;  %469 = vmatpush3.bf16.msra.mxu0 %v505_v25 }
  0x51   :  { %470 = vmatprep.subr.bf16.mxu0 %v624_v0 }
  0x53   :  { %453 = vmatpush3.bf16.msra.mxu1 %v499_v14 }
  0x54   :  { %471 = vmatpush3.bf16.msra.mxu0 %v506_v26 }
  0x55   :  { %472 = vmatprep.subr.bf16.mxu0 %v624_v0 }
  0x58   :  { %473 = vmatpush3.bf16.msra.mxu0 %v507_v27 }
  0xfa   :  { %v135_v20 = vpop.f32.mrf.mxu0 }
  0xfc   :  { %v436_v21 = vpop.f32.mrf.mxu0 }
  0xfe   :  { %v138_v22 = vpop.f32.mrf.mxu0 }
  0xff   :  { %v142_v23 = vpack.c.bf16 %v138_v22, %v135_v20 }
 0x100   :  { %v437_v24 = vpop.f32.mrf.mxu0 }
 0x101   :  { %455 = vmatmul.mubr.bf16.vlgmr.msra.gmra.mxu1 %v142_v23 }
 0x1c1   :  { %v248_v29 = vpop.f32.mrf.mxu1 }
 0x1c2   :  { %v249_v31 = vadd.f32 %v394_v28, %v248_v29 }
 0x1c3   :  { %v456_v30 = vpop.f32.mrf.mxu1 }
 0x1c4   :  { %v255_v35 = vmax.f32 %v249_v31, 0.0 }
 0x1c5   :  { %v251_v32 = vpop.f32.mrf.mxu1 }
 0x1c6   :  { %v252_v33 = vadd.f32 %v394_v28, %v251_v32 }
 0x1c7   :  { %v457_v34 = vpop.f32.mrf.mxu1 }
 0x1c8   :  { %v256_v36 = vmax.f32 %v252_v33, 0.0 }
 0x1ca   :  { %v257_v37 = vpack.c.bf16 %v256_v36, %v255_v35 }
 0x1cc   :  { %475 = vmatmul.mubr.bf16.vlgmr.msra.gmra.mxu0 %v257_v37 }
 0x28c   :  { %v363_v39 = vpop.f32.mrf.mxu0 }
 0x28d   :  { %v364_v40 = vadd.f32 %v403_v38, %v363_v39 }
 0x28e   :  { %v476_v41 = vpop.f32.mrf.mxu0 }
 0x28f   :  { %370 = vst [vmem:[#allocation10] sm:$0xff] %v364_v40 }
 0x290   :  { %v366_v42 = vpop.f32.mrf.mxu0 }
 0x291   :  { %v367_v43 = vadd.f32 %v403_v38, %v366_v42 }
 0x292   :  { %v477_v44 = vpop.f32.mrf.mxu0 }
 0x293   :  { %371 = vst [vmem:[#allocation10 + $0x8] sm:$0xff] %v367_v43 }
 0x294   :  { %599 = shalt.err (!%p596_p10)
}
 0x295   :  { %s627_s23 = smov 128   ;;  %s628_s5 = smov 8  }
 0x296   :  { %383 = dma.vmem_to_hbm [thread:$0]  %s378_s22, 256, %s723_s6, [#allocation4], %s627_s23, %s627_s23, %s628_s5  }
 0x297   :  { %614 = dma.done.wait [#allocation4], 256  }
 0x298   :  { %615 = vsyncadd [#allocation4], 4294967040 }
 0x299   :  { %387 = vsyncpa [#allocation3], 1 }
 0x29a   :  { %388 = vsyncpa [#allocation6], 1 }
 0x29b   :  { %389 = vsyncpa [#allocation9], 1 }
 0x29c   :  { %390 = vsyncpa [#allocation4], 1 }

</bundles_post_ra>
